<compile_context>
chip_gen: v5e
topology: v5e:2x2
jax: 0.10.0
libtpu: 0.0.40
codegen_flags: <defaults>
</compile_context>

<pallas_src>
import jax
import jax.numpy as jnp
from jax import lax
from jax.experimental import pallas as pl
from jax.experimental.pallas import tpu as pltpu

B, CIN, H, W = 2, 4, 16, 16
COUT = 32
COUT_PAD = 128            # lane-dense output channels (zero-padded, sliced after)
KH = KW = 3
KDIM = KH * KW * CIN      # im2col contraction dim = 36
HW = H * W
M = B * HW                # GEMM rows = 512


def _backbone_kernel(p_ref, w_ref, b_ref, o_ref):
    # p_ref: (M, KDIM)        im2col patches, feature order (cin, kh, kw)
    # w_ref: (KDIM, COUT_PAD) conv weights, zero-padded along COUT
    # b_ref: (1, COUT_PAD)    conv bias, zero-padded
    # o_ref: (B, COUT_PAD)    pooled features (padded channels stay exactly 0)
    acc = jnp.dot(p_ref[...], w_ref[...], preferred_element_type=jnp.float32)
    y = jnp.maximum(acc + b_ref[...], 0.0)          # bias + ReLU, (M, COUT_PAD)
    # Global average pool per batch element (static unroll over tiny B).
    for bi in range(B):
        o_ref[bi:bi + 1, :] = jnp.mean(
            y[bi * HW:(bi + 1) * HW, :], axis=0, keepdims=True
        ).astype(o_ref.dtype)


def feature_wrapper_forward(x_nchw, w, b):
    """x_nchw: [B, CIN, H, W]; returns pooled features [B, COUT] (fc == Identity)."""
    # im2col in ONE XLA op (fuses NCHW->NHWC layout change + 'same' zero-pad +
    # patch extraction). Output feature order is channel-major: (cin, kh, kw).
    patches = lax.conv_general_dilated_patches(
        x_nchw, filter_shape=(KH, KW), window_strides=(1, 1), padding="SAME",
        dimension_numbers=("NCHW", "OIHW", "NHWC"))      # -> (B, H, W, KDIM)
    patches = patches.reshape(M, KDIM)

    # Weights (KH*KW, CIN, COUT) -> (CIN*KH*KW, COUT) to match the patch feature
    # ordering, then zero-pad COUT -> COUT_PAD for a lane-dense GEMM/output.
    # (In a real model this reordering/padding is a one-time constant fold.)
    w2 = jnp.transpose(w, (1, 0, 2)).reshape(KDIM, COUT)
    w2 = jnp.pad(w2, ((0, 0), (0, COUT_PAD - COUT)))
    bp = jnp.pad(b, ((0, 0), (0, COUT_PAD - COUT)))

    out = pl.pallas_call(
        _backbone_kernel,
        out_shape=jax.ShapeDtypeStruct((B, COUT_PAD), jnp.float32),
        in_specs=[
            pl.BlockSpec(memory_space=pltpu.MemorySpace.VMEM),
            pl.BlockSpec(memory_space=pltpu.MemorySpace.VMEM),
            pl.BlockSpec(memory_space=pltpu.MemorySpace.VMEM),
        ],
        out_specs=pl.BlockSpec(memory_space=pltpu.MemorySpace.VMEM),
    )(patches, w2, bp)
    return out[:, :COUT]   # drop zero-padded channels


def _reference(x_nchw, w, b):
    # Pure-JAX reference: conv ('same') -> relu -> global average pool.
    x_nhwc = jnp.transpose(x_nchw, (0, 2, 3, 1))
    w_hwio = w.reshape(KH, KW, CIN, COUT)
    y = lax.conv_general_dilated(
        x_nhwc, w_hwio, window_strides=(1, 1), padding="SAME",
        dimension_numbers=("NHWC", "HWIO", "NHWC"),
        precision=lax.Precision.HIGHEST)
    y = jnp.maximum(y + b[0], 0.0)
    return jnp.mean(y, axis=(1, 2))


if __name__ == "__main__":
    key = jax.random.PRNGKey(0)
    kx, kw, kb = jax.random.split(key, 3)

    # Deterministic synthetic parameters (shapes from the backbone's conv layer).
    x = jax.random.normal(kx, (B, CIN, H, W), dtype=jnp.float32)
    w = (jax.random.normal(kw, (KH * KW, CIN, COUT), dtype=jnp.float32)
         * (1.0 / jnp.sqrt(KH * KW * CIN)))
    b = jax.random.normal(kb, (1, COUT), dtype=jnp.float32) * 0.01

    feats = jax.block_until_ready(feature_wrapper_forward(x, w, b))
    ref = jax.block_until_ready(_reference(x, w, b))

    assert feats.shape == (B, COUT), feats.shape
    assert jnp.allclose(feats, ref, atol=1e-4, rtol=1e-4), "mismatch vs reference"
    print("KERNEL_OK")
</pallas_src>

<mosaic_0001>
module attributes {stable_mosaic.version = 11 : i64} {
  func.func @_backbone_kernel(%arg0: memref<512x36xf32, #tpu.memory_space<vmem>>, %arg1: memref<36x128xf32, #tpu.memory_space<vmem>>, %arg2: memref<1x128xf32, #tpu.memory_space<vmem>>, %arg3: memref<2x128xf32, #tpu.memory_space<vmem>>) attributes {dimension_semantics = [], scalar_prefetch = 0 : i64, scratch_operands = 0 : i64, tpu.core_type = #tpu.core_type<tc>} {
    %c0 = arith.constant 0 : index
    %c0_0 = arith.constant 0 : index
    %0 = vector.load %arg0[%c0, %c0_0] : memref<512x36xf32, #tpu.memory_space<vmem>>, vector<512x36xf32>
    %c0_1 = arith.constant 0 : index
    %c0_2 = arith.constant 0 : index
    %1 = vector.load %arg1[%c0_1, %c0_2] : memref<36x128xf32, #tpu.memory_space<vmem>>, vector<36x128xf32>
    %cst = arith.constant dense<0.000000e+00> : vector<512x128xf32>
    %2 = tpu.matmul %0, %1, %cst {dimension_numbers = #tpu.dot_dimension_numbers<[1], [0], [0], [1], [0, 0, 1, 1], [], []>} : vector<512x36xf32>, vector<36x128xf32>, vector<512x128xf32> -> vector<512x128xf32>
    %c0_3 = arith.constant 0 : index
    %c0_4 = arith.constant 0 : index
    %3 = vector.load %arg2[%c0_3, %c0_4] : memref<1x128xf32, #tpu.memory_space<vmem>>, vector<1x128xf32>
    %4 = vector.broadcast %3 : vector<1x128xf32> to vector<512x128xf32>
    %5 = arith.addf %2, %4 : vector<512x128xf32>
    %cst_5 = arith.constant 0.000000e+00 : f32
    %6 = vector.broadcast %cst_5 : f32 to vector<512x128xf32>
    %7 = arith.maximumf %5, %6 : vector<512x128xf32>
    %8 = vector.extract_strided_slice %7 {offsets = [0, 0], sizes = [256, 128], strides = [1, 1]} : vector<512x128xf32> to vector<256x128xf32>
    %cst_6 = arith.constant dense<0.000000e+00> : vector<128xf32>
    %9 = vector.multi_reduction <add>, %8, %cst_6 [0] : vector<256x128xf32> to vector<128xf32>
    %10 = vector.shape_cast %9 : vector<128xf32> to vector<1x128xf32>
    %cst_7 = arith.constant 2.560000e+02 : f32
    %11 = vector.broadcast %cst_7 : f32 to vector<1x128xf32>
    %12 = arith.divf %10, %11 : vector<1x128xf32>
    %c0_8 = arith.constant 0 : index
    %c0_9 = arith.constant 0 : index
    %13 = vector.load %arg3[%c0_8, %c0_9] : memref<2x128xf32, #tpu.memory_space<vmem>>, vector<1x128xf32>
    tpu.vector_store %arg3[%c0_8, %c0_9], %12 {strides = array<i32>} : memref<2x128xf32, #tpu.memory_space<vmem>>, vector<1x128xf32>,
    %14 = vector.extract_strided_slice %7 {offsets = [256, 0], sizes = [256, 128], strides = [1, 1]} : vector<512x128xf32> to vector<256x128xf32>
    %cst_10 = arith.constant dense<0.000000e+00> : vector<128xf32>
    %15 = vector.multi_reduction <add>, %14, %cst_10 [0] : vector<256x128xf32> to vector<128xf32>
    %16 = vector.shape_cast %15 : vector<128xf32> to vector<1x128xf32>
    %cst_11 = arith.constant 2.560000e+02 : f32
    %17 = vector.broadcast %cst_11 : f32 to vector<1x128xf32>
    %18 = arith.divf %16, %17 : vector<1x128xf32>
    %c1 = arith.constant 1 : index
    %c0_12 = arith.constant 0 : index
    %19 = vector.load %arg3[%c1, %c0_12] : memref<2x128xf32, #tpu.memory_space<vmem>>, vector<1x128xf32>
    tpu.vector_store %arg3[%c1, %c0_12], %18 {strides = array<i32>} : memref<2x128xf32, #tpu.memory_space<vmem>>, vector<1x128xf32>,
    return
  }
}

</mosaic_0001>

<bundles_post_ra>
// kernel: tpu_custom_call.1
= control target key start
LH: loop header
LB: loop body
LE: loop exit
PB: predicated region body
PF: predicated region fallthrough
CT: control target
= control target key end

     0   :  { %vm281_vm0 = vcmask 1043456   ;;  %s1219_s0 = inlined_call_operand.vmem [shape: f32[512,36], index: 0, kind: input, shape index: {}]   ;;  %s1220_s1 = inlined_call_operand.vmem [shape: f32[36,128], index: 1, kind: input, shape index: {}]   ;;  %s1221_s2 = inlined_call_operand.vmem [shape: f32[1,128], index: 2, kind: input, shape index: {}]   ;;  %s1222_s3 = inlined_call_operand.hbm [shape: f32[2,128], index: 3, kind: output, shape index: {}]  }
   0x1   :  { %v83_v0 = vld [vmem:[%s1220_s1 + $0x20] sm:$0xf]  ;;  %v82_v1 = vld [vmem:[%s1220_s1 + $0x18] sm:$0xff]  ;;  %v81_v2 = vld [vmem:[%s1220_s1 + $0x10] sm:$0xff] }
   0x2   :  { %659 = vmatpush.msk.msra.mxu0 %vm281_vm0, %v83_v0  ;;  %725 = vmatpush.msk.msra.mxu2 %vm281_vm0, %v83_v0  ;;  %v80_v3 = vld [vmem:[%s1220_s1 + $0x8] sm:$0xff] }
   0x3   :  { %724 = vmatpush.msk.msra.mxu1 %vm281_vm0, %v83_v0  ;;  %726 = vmatpush.msk.msra.mxu3 %vm281_vm0, %v83_v0 }
   0x4   :  { %297 = vmatpush.msra.mxu0 %v82_v1  ;;  %728 = vmatpush.msra.mxu2 %v82_v1 }
   0x5   :  { %727 = vmatpush.msra.mxu1 %v82_v1  ;;  %729 = vmatpush.msra.mxu3 %v82_v1 }
   0x6   :  { %298 = vmatpush.msra.mxu0 %v81_v2  ;;  %731 = vmatpush.msra.mxu2 %v81_v2 }
   0x7   :  { %8 = vsyncpa [#allocation3], 0  ;;  %v79_v4 = vld [vmem:[%s1220_s1] sm:$0xff]  ;;  %730 = vmatpush.msra.mxu1 %v81_v2  ;;  %732 = vmatpush.msra.mxu3 %v81_v2  ;;  %vm88_vm1 = vcmask 293888   ;;  %v16_v9 = vld [vmem:[%s1219_s0 + $0x8] sm:$0xff]  ;;  %s650_s14 = sshll.u32 %s1222_s3, 4  ;;  %s651_s14 = int_to_ptr.hbm [resolvable:$true] %s650_s14 }
   0x8   :  { %299 = vmatpush.msra.mxu0 %v80_v3  ;;  %734 = vmatpush.msra.mxu2 %v80_v3  ;;  %v15_v5 = vld [vmem:[%s1219_s0] sm:$0xff]  ;;  %v48_v10 = vld [vmem:[%s1219_s0 + $0x108] sm:$0xff]  ;;  %v17_v13 = vld [vmem:[%s1219_s0 + $0x10] sm:$0xff] }
   0x9   :  { %v47_v6 = vld [vmem:[%s1219_s0 + $0x100] sm:$0xff]  ;;  %733 = vmatpush.msra.mxu1 %v80_v3  ;;  %735 = vmatpush.msra.mxu3 %v80_v3  ;;  %v32_v11 = vld [vmem:[%s1219_s0 + $0x88] sm:$0xff]  ;;  %v49_v14 = vld [vmem:[%s1219_s0 + $0x110] sm:$0xff] }
   0xa   :  { %300 = vmatpush.msra.mxu0 %v79_v4  ;;  %737 = vmatpush.msra.mxu2 %v79_v4  ;;  %v31_v7 = vld [vmem:[%s1219_s0 + $0x80] sm:$0xff]  ;;  %v64_v12 = vld [vmem:[%s1219_s0 + $0x188] sm:$0xff]  ;;  %v33_v15 = vld [vmem:[%s1219_s0 + $0x90] sm:$0xff] }
   0xb   :  { %v63_v8 = vld [vmem:[%s1219_s0 + $0x180] sm:$0xff]  ;;  %660 = vmatmul.msk.f32.vlgmr.msra.gmra.mxu0 %vm88_vm1, %v15_v5  ;;  %692 = vmatmul.msk.f32.vlgmr.msra.gmra.mxu2 %vm88_vm1, %v47_v6  ;;  %v65_v16 = vld [vmem:[%s1219_s0 + $0x190] sm:$0xff]  ;;  %v18_v17 = vld [vmem:[%s1219_s0 + $0x18] sm:$0xff] }
   0xc   :  { %736 = vmatpush.msra.mxu1 %v79_v4  ;;  %738 = vmatpush.msra.mxu3 %v79_v4  ;;  %v50_v18 = vld [vmem:[%s1219_s0 + $0x118] sm:$0xff]  ;;  %v19_v21 = vld [vmem:[%s1219_s0 + $0x20] sm:$0xff]  ;;  %v20_v25 = vld [vmem:[%s1219_s0 + $0x28] sm:$0xff] }
   0xd   :  { %676 = vmatmul.msk.f32.vlgmr.msra.gmra.mxu1 %vm88_vm1, %v31_v7  ;;  %708 = vmatmul.msk.f32.vlgmr.msra.gmra.mxu3 %vm88_vm1, %v63_v8  ;;  %v34_v19 = vld [vmem:[%s1219_s0 + $0x98] sm:$0xff]  ;;  %v51_v22 = vld [vmem:[%s1219_s0 + $0x120] sm:$0xff]  ;;  %v52_v26 = vld [vmem:[%s1219_s0 + $0x128] sm:$0xff] }
   0xe   :  { %v66_v20 = vld [vmem:[%s1219_s0 + $0x198] sm:$0xff]  ;;  %v35_v23 = vld [vmem:[%s1219_s0 + $0xa0] sm:$0xff]  ;;  %v36_v27 = vld [vmem:[%s1219_s0 + $0xa8] sm:$0xff] }
   0xf   :  { %v67_v24 = vld [vmem:[%s1219_s0 + $0x1a0] sm:$0xff]  ;;  %v68_v28 = vld [vmem:[%s1219_s0 + $0x1a8] sm:$0xff]  ;;  %v21_v29 = vld [vmem:[%s1219_s0 + $0x30] sm:$0xff] }
  0x10   :  { %v53_v30 = vld [vmem:[%s1219_s0 + $0x130] sm:$0xff]  ;;  %v22_v33 = vld [vmem:[%s1219_s0 + $0x38] sm:$0xff]  ;;  %v23_v37 = vld [vmem:[%s1219_s0 + $0x40] sm:$0xff] }
  0x11   :  { %v37_v31 = vld [vmem:[%s1219_s0 + $0xb0] sm:$0xff]  ;;  %v54_v34 = vld [vmem:[%s1219_s0 + $0x138] sm:$0xff]  ;;  %v55_v38 = vld [vmem:[%s1219_s0 + $0x140] sm:$0xff] }
  0x12   :  { %v69_v32 = vld [vmem:[%s1219_s0 + $0x1b0] sm:$0xff]  ;;  %v38_v35 = vld [vmem:[%s1219_s0 + $0xb8] sm:$0xff]  ;;  %v39_v39 = vld [vmem:[%s1219_s0 + $0xc0] sm:$0xff] }
  0x13   :  { %661 = vmatmul.msk.f32.gmra.mxu0 %vm88_vm1, %v16_v9  ;;  %693 = vmatmul.msk.f32.gmra.mxu2 %vm88_vm1, %v48_v10  ;;  %v70_v36 = vld [vmem:[%s1219_s0 + $0x1b8] sm:$0xff]  ;;  %v71_v40 = vld [vmem:[%s1219_s0 + $0x1c0] sm:$0xff]  ;;  %v24_v41 = vld [vmem:[%s1219_s0 + $0x48] sm:$0xff] }
  0x14   :  { %v56_v42 = vld [vmem:[%s1219_s0 + $0x148] sm:$0xff]  ;;  %v25_v45 = vld [vmem:[%s1219_s0 + $0x50] sm:$0xff]  ;;  %v26_v49 = vld [vmem:[%s1219_s0 + $0x58] sm:$0xff] }
  0x15   :  { %677 = vmatmul.msk.f32.gmra.mxu1 %vm88_vm1, %v32_v11  ;;  %709 = vmatmul.msk.f32.gmra.mxu3 %vm88_vm1, %v64_v12  ;;  %v40_v43 = vld [vmem:[%s1219_s0 + $0xc8] sm:$0xff]  ;;  %v57_v46 = vld [vmem:[%s1219_s0 + $0x150] sm:$0xff]  ;;  %v58_v50 = vld [vmem:[%s1219_s0 + $0x158] sm:$0xff] }
  0x16   :  { %v72_v44 = vld [vmem:[%s1219_s0 + $0x1c8] sm:$0xff]  ;;  %v41_v47 = vld [vmem:[%s1219_s0 + $0xd0] sm:$0xff]  ;;  %v42_v51 = vld [vmem:[%s1219_s0 + $0xd8] sm:$0xff] }
  0x17   :  { %v73_v48 = vld [vmem:[%s1219_s0 + $0x1d0] sm:$0xff]  ;;  %v74_v52 = vld [vmem:[%s1219_s0 + $0x1d8] sm:$0xff]  ;;  %v27_v53 = vld [vmem:[%s1219_s0 + $0x60] sm:$0xff] }
  0x18   :  { %v59_v54 = vld [vmem:[%s1219_s0 + $0x160] sm:$0xff]  ;;  %v28_v57 = vld [vmem:[%s1219_s0 + $0x68] sm:$0xff]  ;;  %v29_v61 = vld [vmem:[%s1219_s0 + $0x70] sm:$0xff] }
  0x19   :  { %v43_v55 = vld [vmem:[%s1219_s0 + $0xe0] sm:$0xff]  ;;  %v60_v58 = vld [vmem:[%s1219_s0 + $0x168] sm:$0xff]  ;;  %v61_v62 = vld [vmem:[%s1219_s0 + $0x170] sm:$0xff] }
  0x1a   :  { %v75_v56 = vld [vmem:[%s1219_s0 + $0x1e0] sm:$0xff]  ;;  %v44_v59 = vld [vmem:[%s1219_s0 + $0xe8] sm:$0xff]  ;;  %v45_v63 = vld [vmem:[%s1219_s0 + $0xf0] sm:$0xff] }
  0x1b   :  { %662 = vmatmul.msk.f32.gmra.mxu0 %vm88_vm1, %v17_v13  ;;  %694 = vmatmul.msk.f32.gmra.mxu2 %vm88_vm1, %v49_v14  ;;  %v76_v60 = vld [vmem:[%s1219_s0 + $0x1e8] sm:$0xff]  ;;  %v77_v0 = vld [vmem:[%s1219_s0 + $0x1f0] sm:$0xff]  ;;  %v30_v1 = vld [vmem:[%s1219_s0 + $0x78] sm:$0xff] }
  0x1c   :  { %v62_v2 = vld [vmem:[%s1219_s0 + $0x178] sm:$0xff]  ;;  %v1068_v7 = vld [vmem:[%s1221_s2] ss:$0 sm:$0xff] }
  0x1d   :  { %678 = vmatmul.msk.f32.gmra.mxu1 %vm88_vm1, %v33_v15  ;;  %710 = vmatmul.msk.f32.gmra.mxu3 %vm88_vm1, %v65_v16  ;;  %v46_v3 = vld [vmem:[%s1219_s0 + $0xf8] sm:$0xff] }
  0x1e   :  { %v78_v4 = vld [vmem:[%s1219_s0 + $0x1f8] sm:$0xff]  ;;  %s771_s0 = smov [#allocation2]  }
  0x1f   :  { %s648_s2 = sshll.u32 %s771_s0, 4  ;;  %s649_s2 = int_to_ptr.vmem [resolvable:$true] %s648_s2 }
  0x23   :  { %663 = vmatmul.msk.f32.gmra.mxu0 %vm88_vm1, %v18_v17  ;;  %695 = vmatmul.msk.f32.gmra.mxu2 %vm88_vm1, %v50_v18 }
  0x25   :  { %679 = vmatmul.msk.f32.gmra.mxu1 %vm88_vm1, %v34_v19  ;;  %711 = vmatmul.msk.f32.gmra.mxu3 %vm88_vm1, %v66_v20 }
  0x2b   :  { %664 = vmatmul.msk.f32.gmra.mxu0 %vm88_vm1, %v19_v21  ;;  %696 = vmatmul.msk.f32.gmra.mxu2 %vm88_vm1, %v51_v22 }
  0x2d   :  { %680 = vmatmul.msk.f32.gmra.mxu1 %vm88_vm1, %v35_v23  ;;  %712 = vmatmul.msk.f32.gmra.mxu3 %vm88_vm1, %v67_v24 }
  0x33   :  { %665 = vmatmul.msk.f32.gmra.mxu0 %vm88_vm1, %v20_v25  ;;  %697 = vmatmul.msk.f32.gmra.mxu2 %vm88_vm1, %v52_v26 }
  0x35   :  { %681 = vmatmul.msk.f32.gmra.mxu1 %vm88_vm1, %v36_v27  ;;  %713 = vmatmul.msk.f32.gmra.mxu3 %vm88_vm1, %v68_v28 }
  0x3b   :  { %666 = vmatmul.msk.f32.gmra.mxu0 %vm88_vm1, %v21_v29  ;;  %698 = vmatmul.msk.f32.gmra.mxu2 %vm88_vm1, %v53_v30 }
  0x3d   :  { %682 = vmatmul.msk.f32.gmra.mxu1 %vm88_vm1, %v37_v31  ;;  %714 = vmatmul.msk.f32.gmra.mxu3 %vm88_vm1, %v69_v32 }
  0x43   :  { %667 = vmatmul.msk.f32.gmra.mxu0 %vm88_vm1, %v22_v33  ;;  %699 = vmatmul.msk.f32.gmra.mxu2 %vm88_vm1, %v54_v34 }
  0x45   :  { %683 = vmatmul.msk.f32.gmra.mxu1 %vm88_vm1, %v38_v35  ;;  %715 = vmatmul.msk.f32.gmra.mxu3 %vm88_vm1, %v70_v36 }
  0x4b   :  { %668 = vmatmul.msk.f32.gmra.mxu0 %vm88_vm1, %v23_v37  ;;  %700 = vmatmul.msk.f32.gmra.mxu2 %vm88_vm1, %v55_v38 }
  0x4d   :  { %684 = vmatmul.msk.f32.gmra.mxu1 %vm88_vm1, %v39_v39  ;;  %716 = vmatmul.msk.f32.gmra.mxu3 %vm88_vm1, %v71_v40 }
  0x53   :  { %669 = vmatmul.msk.f32.gmra.mxu0 %vm88_vm1, %v24_v41  ;;  %701 = vmatmul.msk.f32.gmra.mxu2 %vm88_vm1, %v56_v42 }
  0x55   :  { %685 = vmatmul.msk.f32.gmra.mxu1 %vm88_vm1, %v40_v43  ;;  %717 = vmatmul.msk.f32.gmra.mxu3 %vm88_vm1, %v72_v44 }
  0x5b   :  { %670 = vmatmul.msk.f32.gmra.mxu0 %vm88_vm1, %v25_v45  ;;  %702 = vmatmul.msk.f32.gmra.mxu2 %vm88_vm1, %v57_v46 }
  0x5d   :  { %686 = vmatmul.msk.f32.gmra.mxu1 %vm88_vm1, %v41_v47  ;;  %718 = vmatmul.msk.f32.gmra.mxu3 %vm88_vm1, %v73_v48 }
  0x63   :  { %671 = vmatmul.msk.f32.gmra.mxu0 %vm88_vm1, %v26_v49  ;;  %703 = vmatmul.msk.f32.gmra.mxu2 %vm88_vm1, %v58_v50 }
  0x65   :  { %687 = vmatmul.msk.f32.gmra.mxu1 %vm88_vm1, %v42_v51  ;;  %719 = vmatmul.msk.f32.gmra.mxu3 %vm88_vm1, %v74_v52 }
  0x6b   :  { %672 = vmatmul.msk.f32.gmra.mxu0 %vm88_vm1, %v27_v53  ;;  %704 = vmatmul.msk.f32.gmra.mxu2 %vm88_vm1, %v59_v54 }
  0x6d   :  { %688 = vmatmul.msk.f32.gmra.mxu1 %vm88_vm1, %v43_v55  ;;  %720 = vmatmul.msk.f32.gmra.mxu3 %vm88_vm1, %v75_v56 }
  0x73   :  { %673 = vmatmul.msk.f32.gmra.mxu0 %vm88_vm1, %v28_v57  ;;  %705 = vmatmul.msk.f32.gmra.mxu2 %vm88_vm1, %v60_v58 }
  0x75   :  { %689 = vmatmul.msk.f32.gmra.mxu1 %vm88_vm1, %v44_v59  ;;  %721 = vmatmul.msk.f32.gmra.mxu3 %vm88_vm1, %v76_v60 }
  0x7b   :  { %674 = vmatmul.msk.f32.gmra.mxu0 %vm88_vm1, %v29_v61  ;;  %706 = vmatmul.msk.f32.gmra.mxu2 %vm88_vm1, %v61_v62 }
  0x7d   :  { %690 = vmatmul.msk.f32.gmra.mxu1 %vm88_vm1, %v45_v63  ;;  %722 = vmatmul.msk.f32.gmra.mxu3 %vm88_vm1, %v77_v0 }
  0x83   :  { %675 = vmatmul.msk.f32.gmra.mxu0 %vm88_vm1, %v30_v1  ;;  %707 = vmatmul.msk.f32.gmra.mxu2 %vm88_vm1, %v62_v2 }
  0x85   :  { %691 = vmatmul.msk.f32.gmra.mxu1 %vm88_vm1, %v46_v3  ;;  %723 = vmatmul.msk.f32.gmra.mxu3 %vm88_vm1, %v78_v4 }
  0x88   :  { %v302_v5 = vpop.f32.mrf.mxu0 }
  0x89   :  { %v303_v9 = vadd.f32 %v1068_v7, %v302_v5 }
  0x8a   :  { %v1063_v6 = vpop.f32.mrf.mxu1 }
  0x8b   :  { %v494_v14 = vmax.f32 %v303_v9, 0.0 }
  0x8e   :  { %v398_v8 = vpop.f32.mrf.mxu2 }
  0x8f   :  { %v399_v16 = vadd.f32 %v1068_v7, %v398_v8 }
  0x90   :  { %v305_v10 = vpop.f32.mrf.mxu0  ;;  %v1071_v11 = vpop.f32.mrf.mxu3 }
  0x91   :  { %v306_v12 = vadd.f32 %v1068_v7, %v305_v10  ;;  %v526_v22 = vmax.f32 %v399_v16, 0.0 }
  0x92   :  { %v1074_v13 = vpop.f32.mrf.mxu1 }
  0x93   :  { %v495_v15 = vmax.f32 %v306_v12, 0.0 }
  0x95   :  { %v558_v17 = vadd.f32 %v495_v15, %v494_v14 }
  0x96   :  { %v401_v18 = vpop.f32.mrf.mxu2 }
  0x97   :  { %v402_v19 = vadd.f32 %v1068_v7, %v401_v18 }
  0x98   :  { %v308_v20 = vpop.f32.mrf.mxu0  ;;  %v1078_v21 = vpop.f32.mrf.mxu3 }
  0x99   :  { %v527_v23 = vmax.f32 %v402_v19, 0.0  ;;  %v309_v24 = vadd.f32 %v1068_v7, %v308_v20 }
  0x9a   :  { %v1081_v25 = vpop.f32.mrf.mxu1 }
  0x9b   :  { %v604_v26 = vadd.f32 %v527_v23, %v526_v22  ;;  %v496_v27 = vmax.f32 %v309_v24, 0.0 }
  0x9d   :  { %v559_v28 = vadd.f32 %v558_v17, %v496_v27 }
  0x9e   :  { %v404_v29 = vpop.f32.mrf.mxu2 }
  0x9f   :  { %v405_v30 = vadd.f32 %v1068_v7, %v404_v29 }
  0xa0   :  { %v311_v31 = vpop.f32.mrf.mxu0  ;;  %v1084_v32 = vpop.f32.mrf.mxu3 }
  0xa1   :  { %v528_v33 = vmax.f32 %v405_v30, 0.0  ;;  %v312_v34 = vadd.f32 %v1068_v7, %v311_v31 }
  0xa2   :  { %v1087_v35 = vpop.f32.mrf.mxu1 }
  0xa3   :  { %v605_v36 = vadd.f32 %v604_v26, %v528_v33  ;;  %v497_v37 = vmax.f32 %v312_v34, 0.0 }
  0xa5   :  { %v560_v38 = vadd.f32 %v559_v28, %v497_v37 }
  0xa6   :  { %v407_v39 = vpop.f32.mrf.mxu2 }
  0xa7   :  { %v408_v40 = vadd.f32 %v1068_v7, %v407_v39 }
  0xa8   :  { %v314_v41 = vpop.f32.mrf.mxu0  ;;  %v1090_v42 = vpop.f32.mrf.mxu3 }
  0xa9   :  { %v529_v43 = vmax.f32 %v408_v40, 0.0  ;;  %v315_v44 = vadd.f32 %v1068_v7, %v314_v41 }
  0xaa   :  { %v1093_v47 = vpop.f32.mrf.mxu1 }
  0xab   :  { %v606_v45 = vadd.f32 %v605_v36, %v529_v43  ;;  %v498_v46 = vmax.f32 %v315_v44, 0.0 }
  0xad   :  { %v561_v48 = vadd.f32 %v560_v38, %v498_v46 }
  0xae   :  { %v410_v49 = vpop.f32.mrf.mxu2 }
  0xaf   :  { %v411_v50 = vadd.f32 %v1068_v7, %v410_v49 }
  0xb0   :  { %v317_v51 = vpop.f32.mrf.mxu0  ;;  %v1096_v53 = vpop.f32.mrf.mxu3 }
  0xb1   :  { %v530_v52 = vmax.f32 %v411_v50, 0.0  ;;  %v318_v20 = vadd.f32 %v1068_v7, %v317_v51 }
  0xb2   :  { %v1098_v56 = vpop.f32.mrf.mxu1 }
  0xb3   :  { %v607_v54 = vadd.f32 %v606_v45, %v530_v52  ;;  %v499_v23 = vmax.f32 %v318_v20, 0.0 }
  0xb5   :  { %v562_v34 = vadd.f32 %v561_v48, %v499_v23 }
  0xb6   :  { %v413_v55 = vpop.f32.mrf.mxu2 }
  0xb7   :  { %v414_v26 = vadd.f32 %v1068_v7, %v413_v55 }
  0xb8   :  { %v320_v57 = vpop.f32.mrf.mxu0  ;;  %v1100_v58 = vpop.f32.mrf.mxu3 }
  0xb9   :  { %v321_v22 = vadd.f32 %v1068_v7, %v320_v57  ;;  %v531_v38 = vmax.f32 %v414_v26, 0.0 }
  0xba   :  { %v1102_v61 = vpop.f32.mrf.mxu1 }
  0xbb   :  { %v500_v29 = vmax.f32 %v321_v22, 0.0  ;;  %v608_v48 = vadd.f32 %v607_v54, %v531_v38 }
  0xbd   :  { %v563_v41 = vadd.f32 %v562_v34, %v500_v29 }
  0xbe   :  { %v416_v59 = vpop.f32.mrf.mxu2 }
  0xbf   :  { %v417_v31 = vadd.f32 %v1068_v7, %v416_v59 }
  0xc0   :  { %v323_v60 = vpop.f32.mrf.mxu0  ;;  %v1104_v63 = vpop.f32.mrf.mxu3 }
  0xc1   :  { %v324_v24 = vadd.f32 %v1068_v7, %v323_v60  ;;  %v532_v45 = vmax.f32 %v417_v31, 0.0 }
  0xc2   :  { %v1106_v1 = vpop.f32.mrf.mxu1 }
  0xc3   :  { %v501_v36 = vmax.f32 %v324_v24, 0.0 }
  0xc5   :  { %v564_v49 = vadd.f32 %v563_v41, %v501_v36 }
  0xc6   :  { %v419_v62 = vpop.f32.mrf.mxu2 }
  0xc7   :  { %v420_v39 = vadd.f32 %v1068_v7, %v419_v62 }
  0xc8   :  { %v326_v0 = vpop.f32.mrf.mxu0  ;;  %v1108_v4 = vpop.f32.mrf.mxu3 }
  0xc9   :  { %v327_v30 = vadd.f32 %v1068_v7, %v326_v0  ;;  %v533_v52 = vmax.f32 %v420_v39, 0.0  ;;  %v609_v0 = vadd.f32 %v608_v48, %v532_v45 }
  0xca   :  { %v1110_v5 = vpop.f32.mrf.mxu1 }
  0xcb   :  { %v502_v43 = vmax.f32 %v327_v30, 0.0  ;;  %v610_v54 = vadd.f32 %v609_v0, %v533_v52 }
  0xcd   :  { %v565_v59 = vadd.f32 %v564_v49, %v502_v43 }
  0xce   :  { %v422_v2 = vpop.f32.mrf.mxu2 }
  0xcf   :  { %v423_v46 = vadd.f32 %v1068_v7, %v422_v2 }
  0xd0   :  { %v329_v3 = vpop.f32.mrf.mxu0  ;;  %v1112_v10 = vpop.f32.mrf.mxu3 }
  0xd1   :  { %v330_v37 = vadd.f32 %v1068_v7, %v329_v3  ;;  %v534_v3 = vmax.f32 %v423_v46, 0.0 }
  0xd2   :  { %v1114_v14 = vpop.f32.mrf.mxu1 }
  0xd3   :  { %v503_v50 = vmax.f32 %v330_v37, 0.0 }
  0xd5   :  { %v566_v2 = vadd.f32 %v565_v59, %v503_v50 }
  0xd6   :  { %v425_v8 = vpop.f32.mrf.mxu2 }
  0xd7   :  { %v426_v55 = vadd.f32 %v1068_v7, %v425_v8 }
  0xd8   :  { %v332_v9 = vpop.f32.mrf.mxu0  ;;  %v1116_v16 = vpop.f32.mrf.mxu3 }
  0xd9   :  { %v333_v44 = vadd.f32 %v1068_v7, %v332_v9  ;;  %v535_v24 = vmax.f32 %v426_v55, 0.0 }
  0xda   :  { %v1118_v19 = vpop.f32.mrf.mxu1 }
  0xdb   :  { %v504_v60 = vmax.f32 %v333_v44, 0.0 }
  0xdd   :  { %v567_v26 = vadd.f32 %v566_v2, %v504_v60 }
  0xde   :  { %v428_v12 = vpop.f32.mrf.mxu2 }
  0xdf   :  { %v429_v9 = vadd.f32 %v1068_v7, %v428_v12 }
  0xe0   :  { %v335_v15 = vpop.f32.mrf.mxu0  ;;  %v1124_v28 = vpop.f32.mrf.mxu3 }
  0xe1   :  { %v336_v51 = vadd.f32 %v1068_v7, %v335_v15  ;;  %v536_v31 = vmax.f32 %v429_v9, 0.0 }
  0xe2   :  { %v1130_v40 = vpop.f32.mrf.mxu1 }
  0xe3   :  { %v505_v23 = vmax.f32 %v336_v51, 0.0 }
  0xe5   :  { %v568_v12 = vadd.f32 %v567_v26, %v505_v23 }
  0xe6   :  { %v431_v17 = vpop.f32.mrf.mxu2 }
  0xe7   :  { %v432_v8 = vadd.f32 %v1068_v7, %v431_v17  ;;  %v351_v17 = vadd.f32 %v1068_v7, %v1063_v6  ;;  %v357_v6 = vadd.f32 %v1068_v7, %v1081_v25  ;;  %v450_v25 = vadd.f32 %v1068_v7, %v1078_v21 }
  0xe8   :  { %v338_v18 = vpop.f32.mrf.mxu0  ;;  %v1138_v22 = vpop.f32.mrf.mxu3  ;;  %v456_v21 = vadd.f32 %v1068_v7, %v1090_v42  ;;  %v462_v42 = vadd.f32 %v1068_v7, %v1100_v58  ;;  %v468_v58 = vadd.f32 %v1068_v7, %v1108_v4 }
  0xe9   :  { %v339_v62 = vadd.f32 %v1068_v7, %v338_v18  ;;  %v611_v18 = vadd.f32 %v610_v54, %v534_v3  ;;  %v537_v41 = vmax.f32 %v432_v8, 0.0  ;;  %v512_v8 = vmax.f32 %v357_v6, 0.0 }
  0xea   :  { %v1143_v34 = vpop.f32.mrf.mxu1  ;;  %v549_v4 = vmax.f32 %v468_v58, 0.0 }
  0xeb   :  { %v506_v29 = vmax.f32 %v339_v62, 0.0  ;;  %v612_v38 = vadd.f32 %v611_v18, %v535_v24  ;;  %v510_v62 = vmax.f32 %v351_v17, 0.0 }
  0xed   :  { %v613_v45 = vadd.f32 %v612_v38, %v536_v31 }
  0xee   :  { %v434_v27 = vpop.f32.mrf.mxu2 }
  0xef   :  { %v435_v36 = vadd.f32 %v1068_v7, %v434_v27  ;;  %v354_v27 = vadd.f32 %v1068_v7, %v1074_v13  ;;  %v614_v55 = vadd.f32 %v613_v45, %v537_v41  ;;  %v360_v13 = vadd.f32 %v1068_v7, %v1087_v35 }
  0xf0   :  { %v341_v33 = vpop.f32.mrf.mxu0  ;;  %v1153_v52 = vpop.f32.mrf.mxu3  ;;  %v366_v35 = vadd.f32 %v1068_v7, %v1098_v56  ;;  %v372_v56 = vadd.f32 %v1068_v7, %v1106_v1  ;;  %v378_v1 = vadd.f32 %v1068_v7, %v1114_v14 }
  0xf1   :  { %v342_v15 = vadd.f32 %v1068_v7, %v341_v33  ;;  %v569_v33 = vadd.f32 %v568_v12, %v506_v29  ;;  %v538_v49 = vmax.f32 %v435_v36, 0.0  ;;  %v511_v2 = vmax.f32 %v354_v27, 0.0 }
  0xf2   :  { %v363_v29 = vadd.f32 %v1068_v7, %v1093_v47  ;;  %v453_v12 = vadd.f32 %v1068_v7, %v1084_v32  ;;  %v513_v36 = vmax.f32 %v360_v13, 0.0  ;;  %v459_v32 = vadd.f32 %v1068_v7, %v1096_v53 }
  0xf3   :  { %v507_v37 = vmax.f32 %v342_v15, 0.0  ;;  %v615_v0 = vadd.f32 %v614_v55, %v538_v49  ;;  %v1159_v15 = vpop.f32.mrf.mxu1  ;;  %v515_v45 = vmax.f32 %v366_v35, 0.0  ;;  %v465_v53 = vadd.f32 %v1068_v7, %v1104_v63 }
  0xf4   :  { %v514_v47 = vmax.f32 %v363_v29, 0.0  ;;  %v544_v17 = vmax.f32 %v453_v12, 0.0  ;;  %v471_v63 = vadd.f32 %v1068_v7, %v1112_v10  ;;  %v387_v29 = vadd.f32 %v1068_v7, %v1143_v34 }
  0xf5   :  { %v570_v50 = vadd.f32 %v569_v33, %v507_v37  ;;  %v369_v33 = vadd.f32 %v1068_v7, %v1102_v61  ;;  %v375_v61 = vadd.f32 %v1068_v7, %v1110_v5  ;;  %v381_v5 = vadd.f32 %v1068_v7, %v1118_v19 }
  0xf6   :  { %v437_v57 = vpop.f32.mrf.mxu2  ;;  %v550_v10 = vmax.f32 %v471_v63, 0.0  ;;  %v390_v12 = vadd.f32 %v1068_v7, %v1159_v15  ;;  %v480_v35 = vadd.f32 %v1068_v7, %v1138_v22 }
  0xf7   :  { %v438_v43 = vadd.f32 %v1068_v7, %v437_v57  ;;  %v520_v19 = vmax.f32 %v381_v5, 0.0 }
  0xf8   :  { %v344_v20 = vpop.f32.mrf.mxu0  ;;  %v1174_v41 = vpop.f32.mrf.mxu3 }
  0xf9   :  { %v345_v30 = vadd.f32 %v1068_v7, %v344_v20  ;;  %v539_v59 = vmax.f32 %v438_v43, 0.0  ;;  %v447_v20 = vadd.f32 %v1068_v7, %v1071_v11  ;;  %v486_v22 = vadd.f32 %v1068_v7, %v1174_v41 }
  0xfb   :  { %v508_v44 = vmax.f32 %v345_v30, 0.0  ;;  %v616_v54 = vadd.f32 %v615_v0, %v539_v59  ;;  %v542_v31 = vmax.f32 %v447_v20, 0.0  ;;  %v546_v59 = vmax.f32 %v459_v32, 0.0 }
  0xfc   :  { %v518_v0 = vmax.f32 %v375_v61, 0.0  ;;  %v548_v20 = vmax.f32 %v465_v53, 0.0 }
  0xfd   :  { %v571_v57 = vadd.f32 %v570_v50, %v508_v44  ;;  %v545_v50 = vmax.f32 %v456_v21, 0.0 }
  0xfe   :  { %v440_v39 = vpop.f32.mrf.mxu2 }
  0xff   :  { %v441_v51 = vadd.f32 %v1068_v7, %v440_v39  ;;  %v543_v39 = vmax.f32 %v450_v25, 0.0 }
 0x100   :  { %v347_v46 = vpop.f32.mrf.mxu0  ;;  %v488_v14 = vpop.f32.mrf.mxu3 }
 0x101   :  { %v348_v48 = vadd.f32 %v1068_v7, %v347_v46  ;;  %v540_v3 = vmax.f32 %v441_v51, 0.0  ;;  %v392_v51 = vpop.f32.mrf.mxu1 }
 0x103   :  { %v509_v60 = vmax.f32 %v348_v48, 0.0  ;;  %v617_v30 = vadd.f32 %v616_v54, %v540_v3  ;;  %v516_v48 = vmax.f32 %v369_v33, 0.0 }
 0x105   :  { %v572_v9 = vadd.f32 %v571_v57, %v509_v60  ;;  %v517_v57 = vmax.f32 %v372_v56, 0.0 }
 0x106   :  { %v443_v23 = vpop.f32.mrf.mxu2 }
 0x107   :  { %v573_v24 = vadd.f32 %v572_v9, %v510_v62  ;;  %v444_v26 = vadd.f32 %v1068_v7, %v443_v23  ;;  %v547_v62 = vmax.f32 %v462_v42, 0.0  ;;  %v519_v23 = vmax.f32 %v378_v1, 0.0 }
 0x108   :  { %v491_v32 = vpop.f32.mrf.mxu3 }
 0x109   :  { %v574_v11 = vadd.f32 %v573_v24, %v511_v2  ;;  %v541_v18 = vmax.f32 %v444_v26, 0.0  ;;  %v384_v2 = vadd.f32 %v1068_v7, %v1130_v40  ;;  %v770_v24 = vmov 256.0  }
 0x10a   :  { %742 = vrcp.f32 %v770_v24  ;;  %v474_v26 = vadd.f32 %v1068_v7, %v1116_v16  ;;  %v477_v40 = vadd.f32 %v1068_v7, %v1124_v28 }
 0x10b   :  { %v575_v37 = vadd.f32 %v574_v11, %v512_v8  ;;  %v618_v38 = vadd.f32 %v617_v30, %v541_v18  ;;  %v521_v30 = vmax.f32 %v384_v2, 0.0  ;;  %v395_v11 = vpop.f32.mrf.mxu1 }
 0x10c   :  { %v551_v16 = vmax.f32 %v474_v26, 0.0  ;;  %v396_v21 = vadd.f32 %v1068_v7, %v395_v11  ;;  %v552_v28 = vmax.f32 %v477_v40, 0.0 }
 0x10d   :  { %v576_v43 = vadd.f32 %v575_v37, %v513_v36  ;;  %v619_v44 = vadd.f32 %v618_v38, %v542_v31  ;;  %v393_v36 = vadd.f32 %v1068_v7, %v392_v51 }
 0x10f   :  { %v577_v46 = vadd.f32 %v576_v43, %v514_v47  ;;  %v620_v49 = vadd.f32 %v619_v44, %v543_v39  ;;  %v522_v39 = vmax.f32 %v387_v29, 0.0  ;;  %v483_v47 = vadd.f32 %v1068_v7, %v1153_v52 }
 0x110   :  { %v743_v37 = vpop.eup %742  ;;  %v523_v44 = vmax.f32 %v390_v12, 0.0  ;;  %v524_v15 = vmax.f32 %v393_v36, 0.0  ;;  %v492_v52 = vadd.f32 %v1068_v7, %v491_v32 }
 0x111   :  { %v578_v27 = vadd.f32 %v577_v46, %v515_v45  ;;  %v621_v55 = vadd.f32 %v620_v49, %v544_v17  ;;  %v553_v17 = vmax.f32 %v480_v35, 0.0  ;;  %v596_v45 = vmul.f32 256.0, %v743_v37 }
 0x112   :  { %v525_v49 = vmax.f32 %v396_v21, 0.0  ;;  %vm600_vm2 = vweird.f32 %v743_v37 }
 0x113   :  { %v579_v60 = vadd.f32 %v578_v27, %v516_v48  ;;  %v622_v6 = vadd.f32 %v621_v55, %v545_v50  ;;  %v554_v50 = vmax.f32 %v483_v47, 0.0  ;;  %v489_v48 = vadd.f32 %v1068_v7, %v488_v14 }
 0x114   :  { %v597_v61 = vsub.f32 1.0, %v596_v45  ;;  %v555_v55 = vmax.f32 %v486_v22, 0.0 }
 0x115   :  { %v580_v3 = vadd.f32 %v579_v60, %v517_v57  ;;  %v623_v9 = vadd.f32 %v622_v6, %v546_v59  ;;  %v556_v57 = vmax.f32 %v489_v48, 0.0  ;;  %v557_v60 = vmax.f32 %v492_v52, 0.0 }
 0x116   :  { %v598_v6 = vmul.f32 %v743_v37, %v597_v61 }
 0x117   :  { %v581_v13 = vadd.f32 %v580_v3, %v518_v0  ;;  %v624_v54 = vadd.f32 %v623_v9, %v547_v62 }
 0x118   :  { %v599_v5 = vadd.f32 %v743_v37, %v598_v6 }
 0x119   :  { %v582_v25 = vadd.f32 %v581_v13, %v519_v23  ;;  %v625_v8 = vadd.f32 %v624_v54, %v548_v20 }
 0x11a   :  { %v601_v7 = vsel %vm600_vm2, %v743_v37, %v599_v5 }
 0x11b   :  { %v583_v18 = vadd.f32 %v582_v25, %v520_v19  ;;  %v626_v31 = vadd.f32 %v625_v8, %v549_v4 }
 0x11d   :  { %v584_v38 = vadd.f32 %v583_v18, %v521_v30  ;;  %v627_v34 = vadd.f32 %v626_v31, %v550_v10 }
 0x11f   :  { %v628_v33 = vadd.f32 %v627_v34, %v551_v16  ;;  %v585_v43 = vadd.f32 %v584_v38, %v522_v39 }
 0x121   :  { %v629_v56 = vadd.f32 %v628_v33, %v552_v28  ;;  %v586_v46 = vadd.f32 %v585_v43, %v523_v44 }
 0x123   :  { %v630_v42 = vadd.f32 %v629_v56, %v553_v17  ;;  %v587_v51 = vadd.f32 %v586_v46, %v524_v15 }
 0x125   :  { %v631_v27 = vadd.f32 %v630_v42, %v554_v50  ;;  %v588_v59 = vadd.f32 %v587_v51, %v525_v49 }
 0x127   :  { %v632_v53 = vadd.f32 %v631_v27, %v555_v55  ;;  %v589_v1 = vrot.slane %v588_v59, 4 }
 0x129   :  { %v633_v62 = vadd.f32 %v632_v53, %v556_v57  ;;  %v590_v58 = vadd.f32 %v589_v1, %v588_v59 }
 0x12b   :  { %v591_v41 = vrot.slane %v590_v58, 2  ;;  %v634_v0 = vadd.f32 %v633_v62, %v557_v60 }
 0x12d   :  { %v592_v3 = vadd.f32 %v591_v41, %v590_v58  ;;  %v635_v9 = vrot.slane %v634_v0, 4 }
 0x12f   :  { %v593_v20 = vrot.slane %v592_v3, 1  ;;  %v636_v63 = vadd.f32 %v635_v9, %v634_v0 }
 0x131   :  { %v637_v2 = vrot.slane %v636_v63, 2  ;;  %v594_v14 = vadd.f32 %v593_v20, %v592_v3 }
 0x133   :  { %v638_v23 = vadd.f32 %v637_v2, %v636_v63  ;;  %v602_v13 = vmul.f32 %v601_v7, %v594_v14 }
 0x135   :  { %v639_v54 = vrot.slane %v638_v23, 1  ;;  %603 = vst [vmem:[#allocation2] sm:$0x1] %v602_v13 }
 0x137   :  { %v640_v24 = vadd.f32 %v639_v54, %v638_v23 }
 0x139   :  { %v641_v4 = vmul.f32 %v640_v24, %v601_v7 }
 0x13b   :  { %642 = vst [vmem:[#allocation2 + $0x1] sm:$0x1] %v641_v4 }
 0x13c   :  { %653 = dma.vmem_to_hbm [thread:$0]  %s649_s2, 32, %s651_s14, [#allocation3]  }
 0x13d   :  { %768 = dma.done.wait [#allocation3], 32  }
 0x13e   :  { %769 = vsyncadd [#allocation3], 4294967264 }
 0x13f   :  { %658 = vsyncpa [#allocation3], 1 }

</bundles_post_ra>
